<compile_context>
chip_gen: v7x
topology: tpu7x:2x2x1
jax: 0.10.0
libtpu: 0.0.40
codegen_flags: <defaults>
</compile_context>

<pallas_src>
import functools

import jax
import jax.numpy as jnp
from jax.experimental import pallas as pl
from jax.experimental.pallas import tpu as pltpu


def _lrn_kernel(x_ref, o_ref, *, local_size, alpha, beta):
    # x_ref / o_ref: (C, t_hw) -- all channels, one lane tile of the flattened H*W axis.
    C, hw = x_ref.shape
    p = (local_size - 1) // 2
    alpha_over_n = float(alpha) / float(local_size)     # constant-folded at trace time

    x = x_ref[...].astype(jnp.float32)
    sq = x * x

    if p == 0:
        acc = sq
    elif C >= 16:
        # Channel-window sum on the MXU: constant banded 0/1 matrix (exact in f32).
        row = jax.lax.broadcasted_iota(jnp.int32, (C, C), 0)
        col = jax.lax.broadcasted_iota(jnp.int32, (C, C), 1)
        band = (jnp.abs(row - col) <= p).astype(jnp.float32)
        acc = jnp.dot(band, sq,
                      precision=jax.lax.Precision.HIGHEST,
                      preferred_element_type=jnp.float32)
    else:
        # Tiny channel counts: a few exact shifted adds (zero-pad semantics) are cheaper.
        acc = sq
        for d in range(1, min(p, C - 1) + 1):
            z = jnp.zeros((d, hw), jnp.float32)
            acc = acc + jnp.concatenate([sq[d:, :], z], axis=0)        # + x[c+d]^2
            acc = acc + jnp.concatenate([z, sq[: C - d, :]], axis=0)   # + x[c-d]^2

    div = 1.0 + alpha_over_n * acc                      # div >= 1 always
    if float(beta) == 0.75:
        inv = jax.lax.rsqrt(div * jnp.sqrt(div))        # div**-0.75, 2 EUP ops, no log/exp
    else:
        inv = jnp.exp((-float(beta)) * jnp.log(div))    # f32 log/exp (safe: div >= 1)
    o_ref[...] = (x * inv).astype(o_ref.dtype)


def _vmem_capacity_bytes(default=64 << 20):
    try:
        return int(pltpu.get_tpu_info().vmem_capacity_bytes)
    except Exception:
        return default      # conservative fallback: v7x per-TC VMEM


def _plan_hw(hw, max_tile_lanes):
    """Pick (t_hw, hw_padded): lane tile (multiple of 128, <= max_tile_lanes) dividing the
    padded spatial extent. Prefers no padding; pads slightly when that buys a much larger
    tile (e.g. prime-ish H*W), never returning a non-128-aligned last block dim."""
    max_blocks = max(1, max_tile_lanes // 128)
    base = -(-hw // 128)
    best = None
    for extra in range(64):
        k = base + extra
        hw_pad = k * 128
        d = 1
        for cand in range(min(k, max_blocks), 0, -1):
            if k % cand == 0:
                d = cand
                break
        t = 128 * d
        steps = k // d
        # traffic (~hw_pad) + per-grid-step overhead + penalty for extra XLA pad/slice
        # passes whenever padding is introduced at all.
        cost = hw_pad + 512 * steps + (2 * hw if hw_pad != hw else 0)
        if best is None or cost < best[0]:
            best = (cost, t, hw_pad)
    return best[1], best[2]


def lrn(x, local_size=1, alpha=1.0, beta=0.75):
    """Across-channel LRN matching the PyTorch module (ACROSS_CHANNELS=True). x: (N,C,H,W)."""
    # TODO(synk): ACROSS_CHANNELS=False (spatial AvgPool2d variant) is not implemented;
    # the module default (and AlexNet usage) is ACROSS_CHANNELS=True.
    assert local_size % 2 == 1, "only odd local_size (symmetric window), as in AlexNet"
    N, C, H, W = x.shape
    HW = H * W
    itemsize = jnp.dtype(x.dtype).itemsize

    # This kernel is HBM-bound: tile the flattened spatial axis as big as VMEM allows.
    cap = _vmem_capacity_bytes()
    big_vmem = cap >= (100 << 20)                     # v5e/v6e: 128 MiB; v7x: 64 MiB/TC
    target = (28 << 20) if big_vmem else (14 << 20)   # per-step working-set target
    per_lane = C * (4 * itemsize + 6 * 4)             # 2x2-buffered io + ~6 live f32 temps
    t_cap = max(128, min(8192 if big_vmem else 4096,
                         (target // per_lane) // 128 * 128))
    t_hw, HWp = _plan_hw(HW, t_cap)

    x3 = x.reshape(N, C, HW)
    if HWp != HW:
        # Keep stores lane-dense (multiple of 128); padded lanes are sliced off below.
        x3 = jnp.pad(x3, ((0, 0), (0, 0), (0, HWp - HW)))

    kernel = functools.partial(_lrn_kernel, local_size=int(local_size),
                               alpha=float(alpha), beta=float(beta))

    p = (local_size - 1) // 2
    nelem = N * C * HWp
    cost = pl.CostEstimate(
        flops=nelem * (6 + (2 * C if p > 0 else 0)),
        transcendentals=2 * nelem,
        bytes_accessed=2 * nelem * itemsize,
    )
    est = per_lane * t_hw + 4 * C * C + (2 << 20)
    vmem_limit = int(min(max(32 << 20, 2 * est), (cap * 3) // 4))

    out = pl.pallas_call(
        kernel,
        out_shape=jax.ShapeDtypeStruct((N, C, HWp), x.dtype),
        grid_spec=pltpu.PrefetchScalarGridSpec(
            num_scalar_prefetch=0,
            grid=(N, HWp // t_hw),
            in_specs=[pl.BlockSpec((None, C, t_hw), lambda n, h: (n, 0, h))],
            out_specs=pl.BlockSpec((None, C, t_hw), lambda n, h: (n, 0, h)),
        ),
        compiler_params=pltpu.CompilerParams(
            dimension_semantics=("parallel", "parallel"),
            vmem_limit_bytes=vmem_limit,
        ),
        cost_estimate=cost,
    )(x3)

    if HWp != HW:
        out = out[:, :, :HW]
    return out.reshape(N, C, H, W)


def lrn_ref(x, local_size=1, alpha=1.0, beta=0.75):
    """Pure-JAX reference matching the PyTorch module."""
    N, C, H, W = x.shape
    p = (local_size - 1) // 2
    sq = x.astype(jnp.float32) ** 2
    sq_pad = jnp.pad(sq, ((0, 0), (p, p), (0, 0), (0, 0)))
    acc = jnp.zeros_like(sq)
    for d in range(local_size):
        acc = acc + sq_pad[:, d:d + C, :, :]
    div = (1.0 + alpha * acc / local_size) ** beta
    return (x.astype(jnp.float32) / div).astype(x.dtype)


if __name__ == "__main__":
    key = jax.random.PRNGKey(0)
    k1, k2, k3, k4 = jax.random.split(key, 4)
    x_small = jax.random.normal(k1, (2, 4, 16, 16), dtype=jnp.float32)
    x_wide = jax.random.normal(k2, (2, 8, 16, 16), dtype=jnp.float32)
    x_mxu = jax.random.normal(k3, (2, 16, 8, 8), dtype=jnp.float32)   # exercises MXU band path
    x_odd = jax.random.normal(k4, (1, 4, 6, 6), dtype=jnp.float32)    # H*W needs lane padding

    cases = [
        (x_small, 1, 1.0, 0.75),    # module defaults
        (x_small, 5, 1e-4, 0.75),   # AlexNet-style LRN
        (x_wide, 3, 0.5, 0.5),      # general-beta (log/exp) path
        (x_wide, 5, 1.0, 0.75),     # large alpha stresses the window sum
        (x_mxu, 5, 0.1, 0.75),      # C >= 16 -> banded MXU matmul path
        (x_odd, 3, 1.0, 0.75),      # non-128-divisible spatial size -> pad/slice path
    ]
    for xx, ls, a, b in cases:
        y = jax.block_until_ready(lrn(xx, local_size=ls, alpha=a, beta=b))
        y_ref = lrn_ref(xx, local_size=ls, alpha=a, beta=b)
        assert jnp.allclose(y, y_ref, atol=1e-5, rtol=1e-5), (xx.shape, ls, a, b)

    print("KERNEL_OK")
</pallas_src>

<mosaic_0001>
module attributes {stable_mosaic.version = 11 : i64} {
  func.func @_lrn_kernel(%arg0: i32, %arg1: i32, %arg2: memref<1x4x256xf32, #tpu.memory_space<vmem>>, %arg3: memref<1x4x256xf32, #tpu.memory_space<vmem>>) attributes {dimension_semantics = [#tpu.dimension_semantics<parallel>, #tpu.dimension_semantics<parallel>], iteration_bounds = array<i64: 2, 1>, scalar_prefetch = 0 : i64, scratch_operands = 0 : i64, tpu.core_type = #tpu.core_type<tc>, window_params = [{transform_indices = @transform_0, window_bounds = array<i64: 1, 4, 256>}, {transform_indices = @transform_1, window_bounds = array<i64: 1, 4, 256>}]} {
    %c0 = arith.constant 0 : index
    %c0_0 = arith.constant 0 : index
    %c0_1 = arith.constant 0 : index
    %0 = vector.load %arg2[%c0, %c0_0, %c0_1] : memref<1x4x256xf32, #tpu.memory_space<vmem>>, vector<1x4x256xf32>
    %1 = vector.shape_cast %0 : vector<1x4x256xf32> to vector<4x256xf32>
    %2 = arith.mulf %1, %1 : vector<4x256xf32>
    %cst = arith.constant 1.000000e+00 : f32
    %3 = vector.broadcast %cst : f32 to vector<4x256xf32>
    %4 = arith.mulf %3, %2 : vector<4x256xf32>
    %cst_2 = arith.constant 1.000000e+00 : f32
    %5 = vector.broadcast %cst_2 : f32 to vector<4x256xf32>
    %6 = arith.addf %5, %4 : vector<4x256xf32>
    %7 = math.sqrt %6 : vector<4x256xf32>
    %8 = arith.mulf %6, %7 : vector<4x256xf32>
    %9 = math.rsqrt %8 : vector<4x256xf32>
    %10 = arith.mulf %1, %9 : vector<4x256xf32>
    %c0_3 = arith.constant 0 : index
    %c0_4 = arith.constant 0 : index
    %c0_5 = arith.constant 0 : index
    %11 = vector.load %arg3[%c0_3, %c0_4, %c0_5] : memref<1x4x256xf32, #tpu.memory_space<vmem>>, vector<1x4x256xf32>
    %12 = vector.shape_cast %11 : vector<1x4x256xf32> to vector<4x256xf32>
    %13 = vector.shape_cast %10 : vector<4x256xf32> to vector<1x4x256xf32>
    tpu.vector_store %arg3[%c0_3, %c0_4, %c0_5], %13 {strides = array<i32>} : memref<1x4x256xf32, #tpu.memory_space<vmem>>, vector<1x4x256xf32>,
    return
  }
  func.func @transform_0(%arg0: i32, %arg1: i32) -> (i32, i32, i32) {
    %c0_i32 = arith.constant 0 : i32
    %c0_i32_0 = arith.constant 0 : i32
    return %arg0, %c0_i32, %arg1 : i32, i32, i32
  }
  func.func @transform_1(%arg0: i32, %arg1: i32) -> (i32, i32, i32) {
    %c0_i32 = arith.constant 0 : i32
    %c0_i32_0 = arith.constant 0 : i32
    return %arg0, %c0_i32, %arg1 : i32, i32, i32
  }
}

</mosaic_0001>

<bundles_post_ra>
// kernel: tpu_custom_call.1
= control target key start
LH: loop header
LB: loop body
LE: loop exit
PB: predicated region body
PF: predicated region fallthrough
CT: control target
= control target key end

     0   :  { %6 = vsyncpa [#allocation3], 0  ;;  %s649_s0 = inlined_call_operand.hbm [shape: f32[2,4,256], index: 0, kind: input, shape index: {}]   ;;  %s650_s1 = inlined_call_operand.hbm [shape: f32[2,4,256], index: 1, kind: output, shape index: {}]  }
   0x1   :  { %8 = vsyncpa [#allocation3 + $0x1], 0 }
   0x2   :  { %9 = vsyncpa [#allocation4], 0 }
   0x3   :  { %11 = vsyncpa [#allocation4 + $0x1], 0  ;;  %s477_s6 = smov 0   ;;  %s479_s7 = smov 0  }
   0x4   :  { %s481_s8 = smov 0   ;;  %s483_s9 = smov 0  }
   0x5   :  { %s485_s10 = smov 0   ;;  %s487_s11 = smov 0  }
   0x6 LB: > { %s268_s12 = sadd.s32 4294967295, %s463_s11   ;;  %s269_s13 = sadd.s32 4294967294, %s463_s11   ;;  %s463_s11 = sphi %s487_s11, %s17_s11   ;;  %s459_s10 = sphi %s485_s10, %s666_s10   ;;  %s455_s9 = sphi %s483_s9, %s665_s9   ;;  %s451_s8 = sphi %s481_s8, %s664_s8   ;;  %s447_s7 = sphi %s479_s7, %s663_s7   ;;  %s443_s6 = sphi %s477_s6, %s662_s6  }
   0x7   : > { %s29_s14 = sadd.s32 1, %s459_s10  ;;  %s38_s15 = sadd.s32 1, %s451_s8 }
   0x8   : > { %p31_p0 = scmp.ge.s32.totalorder %s29_s14, 2  ;;  %p45_p1 = scmp.ne.s32.totalorder %s451_s8, %s447_s7 }
   0x9   : > { %p46_p2 = scmp.eq.s32.totalorder %s463_s11, 0  ;;  %p51_p3 = scmp.ne.s32.totalorder %s447_s7, %s443_s6 }
   0xa   : > { %s668_s14 = smov (%p31_p0, %s29_s14), 0  ;;  %p52_p5 = scmp.eq.s32.totalorder %s268_s12, 0 }
   0xb   : > { %p518_p4 = por %p46_p2, %p45_p1  ;;  %s33_s17 = ssub.s32 %s459_s10, %s668_s14 }
   0xc   : > { %p77_p6 = scmp.eq.s32.totalorder %s268_s12, 1  ;;  %p36_p7 = scmp.eq.s32.totalorder %s33_s17, 0 }
   0xd   : > { %p524_p8 = por %p52_p5, %p51_p3  ;;  %p83_p10 = scmp.eq.s32.totalorder %s269_s13, 1 }
   0xe   : > { %p528_p9 = por %p77_p6, %p45_p1  ;;  %p297_p13 = scmp.lt.s32.totalorder %s463_s11, 2 }
   0xf   : > { %s533_s20 = scalar_select %p36_p7, %s451_s8, %s38_s15  }
  0x10   : > { %s654_s19 = scalar_select %p528_p9, 1, 0 }
  0x11   : > { %p535_p11 = por %p83_p10, %p51_p3  ;;  %s103_s22 = sand.u32 1, %s451_s8  }
  0x12   : > { %s272_s23 = sshll.u32 %s103_s22, 3  ;;  %s283_s24 = sshll.u32 %s459_s10, 7 }
  0x13   : > { %s655_s21 = scalar_select %p535_p11, 1, 0 }
  0x14   : > { %s546_s27 = scalar_lea.hbm %s649_s0, %s283_s24  ;;  %s107_s28 = scalar_lea.vmem [#allocation2], %s272_s23 }
  0x15   : > { %s117_s29 = sshll.u32 %s107_s28, 4  ;;  %p552_p0 = pnand %p297_p13, %p518_p4  ;;  %s548_s29 = int_to_ptr.vmem [resolvable:$true] %s117_s29 }
  0x16   : > { %s104_s2 = scalar_lea.sflag [#allocation3], %s103_s22  ;;  %s351_s3 = scalar_lea.hbm %s546_s27, 128 }
  0x17   : > { %p352_p3 = scmp.ne.s32.totalorder %s546_s27, %s351_s3  ;;  %p353_p5 = pneg %p552_p0 }
  0x18   : > { %s356_s12 = scalar_lea.hbm %s649_s0, 256  ;;  %p357_p4 = scmp.lt.u32.totalorder %s546_s27, %s649_s0 }
  0x19   : > { %p354_p6 = pnand %p353_p5, %p352_p3  ;;  %p358_p10 = scmp.lt.u32.totalorder %s356_s12, %s351_s3 }
  0x1a   : > { %p360_p12 = scmp.lt.u32.totalorder %s351_s3, %s546_s27 }
  0x1b   : > { %p355_p7 = pneg %p354_p6  ;;  %p359_p13 = por %p358_p10, %p357_p4 }
  0x1d   : > { %p361_p1 = por %p360_p12, %p359_p13 }
  0x1f   : > { %p362_p2 = pnand %p361_p1, %p355_p7 }
  0x21   : > { %365 = shalt.err (!%p362_p2)
}
  0x22   : > { %s366_s16 = scalar_lea.vmem %s548_s29, 128  ;;  %s465_s17 = smov [#allocation2]  }
  0x23   : > { %p367_p3 = scmp.ne.s32.totalorder %s548_s29, %s366_s16  ;;  %s371_s22 = sshll.u32 %s465_s17, 4  ;;  %s372_s22 = int_to_ptr.vmem [resolvable:$false] %s371_s22 }
  0x24   : > { %s373_s23 = scalar_lea.vmem %s372_s22, 256  ;;  %p374_p9 = scmp.lt.s32.totalorder %s548_s29, %s372_s22 }
  0x25   : > { %p369_p6 = pnand %p367_p3, %p353_p5  ;;  %p375_p4 = scmp.lt.s32.totalorder %s373_s23, %s366_s16 }
  0x27   : > { %p370_p11 = pneg %p369_p6  ;;  %p376_p10 = por %p375_p4, %p374_p9 }
  0x29   : > { %p377_p12 = pnand %p376_p10, %p370_p11 }
  0x2b   : > { %380 = shalt.err (!%p377_p12)
}
  0x2c   : > { %292 = dma.hbm_to_vmem [thread:$0]  (!%p552_p0), %s546_s27, 128, %s548_s29, %s104_s2  }
  0x2d   : > { %p657_p1 = scmp.lt.s32.totalorder %s463_s11, 3  ;;  %p658_p2 = scmp.ge.s32.totalorder %s463_s11, 1 }
  0x2f   : > { %p123_p5 = pnand %p658_p2, %p657_p1 }
  0x30   : > { %s588_s24 = sand.u32 (!%p123_p5), 1, %s447_s7  }
  0x31   : > { %126 = sbr.rel (%p123_p5) target bundleno = 106 (0x6a), region = 24  ;;  %s276_s25 = sshll.u32 (!%p123_p5), %s588_s24, 3 }
  0x32   : > { %s129_s26 = scalar_lea.sflag (!%p123_p5), [#allocation3], %s588_s24  ;;  %s132_s28 = scalar_lea.vmem (!%p123_p5), [#allocation2], %s276_s25 }
  0x38   : > { %434 = dma.done.wait (%p524_p8), %s129_s26, 128  }
  0x39   : > { %436 = vsyncadd (%p524_p8), %s129_s26, 4294967168  ;;  %v153_v0 = vld [vmem:[%s132_s28] sm:$0xff]  ;;  %s150_s27 = scalar_lea.vmem [#allocation5], %s276_s25  ;;  %s284_s18 = sshll.u32 %s455_s9, 7 }
  0x3a   : > { %v154_v1 = vmul.f32 %v153_v0, %v153_v0  ;;  %s184_s29 = sshll.u32 %s150_s27, 4  ;;  %s602_s3 = scalar_lea.hbm %s650_s1, %s284_s18  ;;  %s597_s29 = int_to_ptr.vmem [resolvable:$true] %s184_s29 }
  0x3b   : > { %s168_s4 = scalar_lea.sflag [#allocation4], %s588_s24  ;;  %s381_s5 = scalar_lea.vmem %s597_s29, 128 }
  0x3c   : > { %v155_v2 = vadd.f32 1.0, %v154_v1  ;;  %p382_p8 = scmp.ne.s32.totalorder %s597_s29, %s381_s5  ;;  %p659_p9 = scmp.ne.s32.totalorder %s654_s19, 0 }
  0x3d   : > { %s466_s9 = smov [#allocation5]  }
  0x3e   : > { %347 = vrsqrt.f32 %v155_v2  ;;  %vm158_vm0 = vcmp.eq.f32.partialorder %v155_v2, inf  ;;  %v161_v4 = vand.u32 2147483648, %v155_v2  ;;  %vm160_vm1 = vcmp.eq.f32.partialorder %v155_v2, 0.0  ;;  %p383_p11 = pnand %p382_p8, %p659_p9  ;;  %s385_s12 = sshll.u32 %s466_s9, 4  ;;  %s386_s12 = int_to_ptr.vmem [resolvable:$false] %s385_s12 }
  0x3f   : > { %s387_s13 = scalar_lea.vmem %s386_s12, 256  ;;  %p388_p7 = scmp.lt.s32.totalorder %s597_s29, %s386_s12 }
  0x40   : > { %p384_p0 = pneg %p383_p11  ;;  %p389_p13 = scmp.lt.s32.totalorder %s387_s13, %s381_s5 }
  0x42   : > { %p390_p3 = por %p389_p13, %p388_p7 }
  0x44   : > { %p391_p6 = pnand %p390_p3, %p384_p0 }
  0x48   : > { %v348_v3 = vpop.eup %347 }
  0x49   : > { %v157_v5 = vmul.f32 %v348_v3, %v155_v2 }
  0x4b   : > { %v159_v6 = vsel %vm158_vm0, %v155_v2, %v157_v5 }
  0x4c   : > { %v162_v7 = vsel %vm160_vm1, %v161_v4, %v159_v6 }
  0x4d   : > { %v163_v8 = vmul.f32 %v162_v7, %v155_v2 }
  0x4f   : > { %349 = vrsqrt.f32 %v163_v8 }
  0x59   : > { %v350_v9 = vpop.eup %349 }
  0x5a   : > { %v165_v10 = vmul.f32 %v350_v9, %v153_v0 }
  0x5c   : > { %166 = vst [vmem:[%s150_s27] sm:$0xff] %v165_v10 }
  0x5d   : > { %394 = shalt.err (!%p391_p6)
}
  0x5e   : > { %s395_s15 = scalar_lea.hbm %s602_s3, 128  ;;  %s399_s22 = scalar_lea.hbm %s650_s1, 256 }
  0x5f   : > { %p396_p4 = scmp.ne.s32.totalorder %s602_s3, %s395_s15  ;;  %p400_p1 = scmp.lt.u32.totalorder %s602_s3, %s650_s1 }
  0x60   : > { %p401_p2 = scmp.lt.u32.totalorder %s399_s22, %s395_s15  ;;  %p403_p8 = scmp.lt.u32.totalorder %s395_s15, %s602_s3 }
  0x61   : > { %p397_p10 = pnand %p396_p4, %p659_p9 }
  0x62   : > { %p402_p5 = por %p401_p2, %p400_p1 }
  0x63   : > { %p398_p12 = pneg %p397_p10 }
  0x64   : > { %p404_p11 = por %p403_p8, %p402_p5 }
  0x66   : > { %p405_p0 = pnand %p404_p11, %p398_p12 }
  0x68   : > { %408 = shalt.err (!%p405_p0)
}
  0x69   : > { %287 = dma.vmem_to_hbm [thread:$0]  (%p659_p9), %s597_s29, 128, %s602_s3, %s168_s4  }
  0x6a PF: > { %s196_s25 = sand.u32 1, %s443_s6   ;;  %p660_p7 = scmp.ne.s32.totalorder %s655_s21, 0 }
  0x6b   : > { %p661_p13 = scmp.ge.s32.totalorder %s463_s11, 2  ;;  %s197_s26 = scalar_lea.sflag [#allocation4], %s196_s25 }
  0x6d   : > { %p294_p3 = pnand %p661_p13, %p660_p7 }
  0x6f   : > { %438 = dma.done.wait (!%p294_p3), %s197_s26, 128  }
  0x70   : > { %440 = vsyncadd (!%p294_p3), %s197_s26, 4294967168  ;;  %s17_s11 = sadd.s32 1, %s463_s11   ;;  %s662_s6 = smov %s447_s7 }
  0x71   : > { %p14_p6 = scmp.ge.s32.totalorder %s17_s11, 4   ;;  %s663_s7 = smov %s451_s8 }
  0x72   : > { %s664_s8 = smov %s533_s20  ;;  %s665_s9 = smov %s459_s10 }
  0x73   : > { %s666_s10 = smov %s668_s14  ;;  %16 = sbr.rel (!%p14_p6) target bundleno = 6 (0x6), region = 69 }
  0x7a   :  { %202 = vsyncpa [#allocation3], 1 }
  0x7b   :  { %204 = vsyncpa [#allocation3 + $0x1], 1 }
  0x7c   :  { %205 = vsyncpa [#allocation4], 1 }
  0x7d   :  { %207 = vsyncpa [#allocation4 + $0x1], 1 }

</bundles_post_ra>
